<compile_context>
chip_gen: v6e
topology: v6e:2x2x1
jax: 0.10.0
libtpu: 0.0.40
codegen_flags: <defaults>
</compile_context>

<pallas_src>
import functools
import math

import jax
import jax.numpy as jnp
from jax.experimental import pallas as pl
from jax.experimental.pallas import tpu as pltpu


HIDDEN = 128    # hidden width of the PyTorch DenseNet
LANE = 128      # TPU lane width
SUBLANE = 8     # f32/bf16-operand sublane alignment for row tiles


def _round_up(x, m):
    return ((x + m - 1) // m) * m


def _pick_tile(m_sub):
    """Pick the batch-tile height (m_sub is already a multiple of SUBLANE).

    Scoring: minimize total padded rows (DMA + MXU work), with a small (~6%)
    penalty on single-step grids for batches >= 256 so v7x's two TensorCores
    both get row tiles; ties prefer larger tiles (fewer grid steps)."""
    cands = set(t for t in (128, 256, 512) if t <= m_sub)
    if m_sub <= 512:
        cands.add(m_sub)                                   # single full tile
    half = _round_up((m_sub + 1) // 2, SUBLANE)            # even two-way split
    if half <= 512:
        cands.add(half)

    def score(tm):
        m_pad = _round_up(m_sub, tm)
        grid = m_pad // tm
        penalty = (m_pad // 16) if (grid < 2 and m_sub >= 256) else 0
        return (m_pad + penalty, -tm)

    return min(cands, key=score)


# ----------------------------------------------------------------------------
# Fused MLP kernel: per batch tile, run the whole Linear/ReLU stack on the MXU.
# Operand count is specialized on (layer_num > 0, has_head).
# ----------------------------------------------------------------------------
def _mlp_kernel(*refs, layer_num, has_head):
    it = iter(refs)
    x_ref = next(it)                    # (tm, d_pad) bf16
    w_in_ref = next(it)                 # (d_pad, 128) bf16
    b_in_ref = next(it)                 # (1, 128) f32
    w_h_ref = next(it) if layer_num > 0 else None   # (L, 128, 128) bf16
    b_h_ref = next(it) if layer_num > 0 else None   # (L, 1, 128) f32
    w_out_ref = next(it) if has_head else None      # (128, a_pad) bf16
    b_out_ref = next(it) if has_head else None      # (1, a_pad) f32
    o_ref = next(it)                    # (tm, n_out) f32

    # First Linear + ReLU.  bf16 MXU operands, f32 accumulation; bias-add and
    # ReLU stay f32 (fast VPU path on all of v5e/v6e/v7x).
    acc = jnp.dot(x_ref[...], w_in_ref[...], preferred_element_type=jnp.float32)
    h = jnp.maximum(acc + b_in_ref[...], 0.0)

    # Hidden Linear + ReLU stack (layer_num is a Python int -> static unroll).
    for i in range(layer_num):
        acc = jnp.dot(h.astype(w_h_ref.dtype), w_h_ref[i],
                      preferred_element_type=jnp.float32)
        h = jnp.maximum(acc + b_h_ref[i], 0.0)

    # Optional action head (no ReLU); output is 128-lane padded (lane-dense).
    if has_head:
        acc = jnp.dot(h.astype(w_out_ref.dtype), w_out_ref[...],
                      preferred_element_type=jnp.float32)
        o_ref[...] = (acc + b_out_ref[...]).astype(o_ref.dtype)
    else:
        o_ref[...] = h.astype(o_ref.dtype)


# ----------------------------------------------------------------------------
# Parameters: built deterministically, pre-transposed/padded ONCE for the kernel
# ----------------------------------------------------------------------------
def init_dense_params(key, layer_num, state_shape, action_shape=0):
    """Weights stored (in, out), zero-padded to 128-lane-aligned dims, bf16."""
    d_in = int(math.prod(state_shape)) if hasattr(state_shape, "__len__") else int(state_shape)
    a_dim = int(math.prod(action_shape)) if hasattr(action_shape, "__len__") else int(action_shape)
    has_head = a_dim > 0

    d_pad = _round_up(d_in, LANE)
    a_pad = _round_up(max(a_dim, 1), LANE)

    ks = jax.random.split(key, 6)
    scale = 0.05

    def nrm(k, shape):
        return (scale * jax.random.normal(k, shape)).astype(jnp.float32)

    wd = jnp.bfloat16   # MXU-native operand dtype; f32 accumulation in-kernel

    # First layer: (d_in, 128) placed into a zero-padded (d_pad, 128) slab.
    w_in = jnp.zeros((d_pad, HIDDEN), jnp.float32).at[:d_in].set(
        nrm(ks[0], (d_in, HIDDEN)))
    b_in = nrm(ks[1], (1, HIDDEN))

    params = {
        "d_in": d_in,
        "layer_num": int(layer_num),
        "has_head": has_head,
        "out_dim": a_dim if has_head else HIDDEN,
        "w_in": w_in.astype(wd), "b_in": b_in,
    }

    # Hidden stack only when it exists (don't ship zeroed dummy operands).
    if layer_num > 0:
        params["w_h"] = nrm(ks[2], (layer_num, HIDDEN, HIDDEN)).astype(wd)
        params["b_h"] = nrm(ks[3], (layer_num, 1, HIDDEN))

    # Action head, padded to a lane-dense 128-wide output (padded cols are 0).
    if has_head:
        w_out = jnp.zeros((HIDDEN, a_pad), jnp.float32).at[:, :a_dim].set(
            nrm(ks[4], (HIDDEN, a_dim)))
        b_out = jnp.zeros((1, a_pad), jnp.float32).at[:, :a_dim].set(
            nrm(ks[5], (1, a_dim)))
        params["w_out"] = w_out.astype(wd)
        params["b_out"] = b_out
    return params


# ----------------------------------------------------------------------------
# Forward pass (semantics of DenseNet.forward: flatten -> MLP -> (logits, state))
# ----------------------------------------------------------------------------
def dense_forward(params, x, state=None):
    batch = x.shape[0]
    d_in = params["d_in"]
    d_pad = params["w_in"].shape[0]
    layer_num = params["layer_num"]
    has_head = params["has_head"]
    n_out = params["w_out"].shape[1] if has_head else HIDDEN

    # s.view(batch, -1) + cast to bf16 for the kernel's input stream (halves
    # the dominant HBM read; f32 accumulation happens on the MXU).
    x = x.reshape(batch, -1).astype(jnp.bfloat16)
    assert x.shape[1] == d_in, (x.shape, d_in)

    # Batch tiling (sublane-aligned rows); skip the pad entirely when it's a
    # no-op, otherwise cast+pad fuse into a single pass.
    m_sub = _round_up(max(batch, 1), SUBLANE)
    tm = _pick_tile(m_sub)
    m_pad = _round_up(m_sub, tm)
    if (m_pad, d_pad) != (batch, d_in):
        x = jnp.pad(x, ((0, m_pad - batch), (0, d_pad - d_in)))

    # Grid-invariant operands: single-buffered (no pointless double-buffer VMEM).
    def const_spec(arr):
        nd = arr.ndim
        return pl.BlockSpec(arr.shape, lambda i, _nd=nd: (0,) * _nd,
                            pipeline_mode=pl.Buffered(1))

    operands = [x, params["w_in"], params["b_in"]]
    in_specs = [
        pl.BlockSpec((tm, d_pad), lambda i: (i, 0)),   # x: tiled over batch
        const_spec(params["w_in"]),
        const_spec(params["b_in"]),
    ]
    if layer_num > 0:
        operands += [params["w_h"], params["b_h"]]
        in_specs += [const_spec(params["w_h"]), const_spec(params["b_h"])]
    if has_head:
        operands += [params["w_out"], params["b_out"]]
        in_specs += [const_spec(params["w_out"]), const_spec(params["b_out"])]

    flops = 2 * m_pad * (d_pad * HIDDEN + layer_num * HIDDEN * HIDDEN
                         + (HIDDEN * n_out if has_head else 0))
    bytes_accessed = (
        m_pad * d_pad * 2                                            # bf16 x
        + (d_pad * HIDDEN + layer_num * HIDDEN * HIDDEN
           + (HIDDEN * n_out if has_head else 0)) * 2                # bf16 weights
        + (HIDDEN + layer_num * HIDDEN + (n_out if has_head else 0)) * 4  # f32 biases
        + m_pad * n_out * 4)                                         # f32 output

    kernel = functools.partial(_mlp_kernel, layer_num=layer_num,
                               has_head=has_head)

    out = pl.pallas_call(
        kernel,
        out_shape=jax.ShapeDtypeStruct((m_pad, n_out), jnp.float32),
        grid=(m_pad // tm,),
        in_specs=in_specs,
        out_specs=pl.BlockSpec((tm, n_out), lambda i: (i, 0)),
        compiler_params=pltpu.CompilerParams(
            dimension_semantics=("parallel",)),
        cost_estimate=pl.CostEstimate(flops=int(flops), transcendentals=0,
                                      bytes_accessed=int(bytes_accessed)),
    )(*operands)

    logits = out[:batch, :params["out_dim"]]
    return logits, state


# ----------------------------------------------------------------------------
# Plain-JAX reference (for in-script correctness check only)
# ----------------------------------------------------------------------------
def _ref_forward(params, x):
    s = x.reshape(x.shape[0], -1).astype(jnp.float32)
    w_in = params["w_in"].astype(jnp.float32)[:params["d_in"]]
    h = jnp.maximum(s @ w_in + params["b_in"][0], 0.0)
    for i in range(params["layer_num"]):
        h = jnp.maximum(h @ params["w_h"][i].astype(jnp.float32)
                        + params["b_h"][i, 0], 0.0)
    if params["has_head"]:
        o = params["out_dim"]
        h = (h @ params["w_out"].astype(jnp.float32)[:, :o]
             + params["b_out"][0, :o])
    return h


if __name__ == "__main__":
    # Small shapes consistent with the module:
    #   batch=2, state_shape=(4, 16, 16) -> flattened 1024, layer_num=2,
    #   action_shape=6 (padded to 128 inside, sliced back to 6 at the end).
    batch, state_shape, layer_num, action_dim = 2, (4, 16, 16), 2, 6

    key = jax.random.PRNGKey(0)
    kx, kp = jax.random.split(key)
    x = jax.random.uniform(kx, (batch,) + state_shape, dtype=jnp.float32)
    params = init_dense_params(kp, layer_num, state_shape, action_dim)

    fwd = jax.jit(functools.partial(dense_forward, params))
    logits, state = fwd(x)
    logits = jax.block_until_ready(logits)

    assert logits.shape == (batch, action_dim), logits.shape
    assert state is None

    ref = _ref_forward(params, x)
    assert jnp.allclose(logits, ref, atol=5e-2, rtol=5e-2), (
        float(jnp.max(jnp.abs(logits - ref))))

    print("KERNEL_OK")
</pallas_src>

<mosaic_0001>
module attributes {stable_mosaic.version = 11 : i64} {
  func.func @_mlp_kernel(%arg0: i32, %arg1: memref<8x1024xbf16, #tpu.memory_space<vmem>>, %arg2: memref<1024x128xbf16, #tpu.memory_space<vmem>>, %arg3: memref<1x128xf32, #tpu.memory_space<vmem>>, %arg4: memref<2x128x128xbf16, #tpu.memory_space<vmem>>, %arg5: memref<2x1x128xf32, #tpu.memory_space<vmem>>, %arg6: memref<128x128xbf16, #tpu.memory_space<vmem>>, %arg7: memref<1x128xf32, #tpu.memory_space<vmem>>, %arg8: memref<8x128xf32, #tpu.memory_space<vmem>>) attributes {dimension_semantics = [#tpu.dimension_semantics<parallel>], iteration_bounds = array<i64: 1>, scalar_prefetch = 0 : i64, scratch_operands = 0 : i64, tpu.core_type = #tpu.core_type<tc>, window_params = [{transform_indices = @transform_0, window_bounds = array<i64: 8, 1024>}, {pipeline_mode = #tpu.pipeline_mode<synchronous>, transform_indices = @transform_1, window_bounds = array<i64: 1024, 128>}, {pipeline_mode = #tpu.pipeline_mode<synchronous>, transform_indices = @transform_2, window_bounds = array<i64: 1, 128>}, {pipeline_mode = #tpu.pipeline_mode<synchronous>, transform_indices = @transform_3, window_bounds = array<i64: 2, 128, 128>}, {pipeline_mode = #tpu.pipeline_mode<synchronous>, transform_indices = @transform_4, window_bounds = array<i64: 2, 1, 128>}, {pipeline_mode = #tpu.pipeline_mode<synchronous>, transform_indices = @transform_5, window_bounds = array<i64: 128, 128>}, {pipeline_mode = #tpu.pipeline_mode<synchronous>, transform_indices = @transform_6, window_bounds = array<i64: 1, 128>}, {transform_indices = @transform_7, window_bounds = array<i64: 8, 128>}]} {
    %c0 = arith.constant 0 : index
    %c0_0 = arith.constant 0 : index
    %0 = vector.load %arg1[%c0, %c0_0] : memref<8x1024xbf16, #tpu.memory_space<vmem>>, vector<8x1024xbf16>
    %c0_1 = arith.constant 0 : index
    %c0_2 = arith.constant 0 : index
    %1 = vector.load %arg2[%c0_1, %c0_2] : memref<1024x128xbf16, #tpu.memory_space<vmem>>, vector<1024x128xbf16>
    %cst = arith.constant dense<0.000000e+00> : vector<8x128xf32>
    %2 = tpu.matmul %0, %1, %cst {dimension_numbers = #tpu.dot_dimension_numbers<[1], [0], [0], [1], [0, 0, 1, 1], [], []>} : vector<8x1024xbf16>, vector<1024x128xbf16>, vector<8x128xf32> -> vector<8x128xf32>
    %c0_3 = arith.constant 0 : index
    %c0_4 = arith.constant 0 : index
    %3 = vector.load %arg3[%c0_3, %c0_4] : memref<1x128xf32, #tpu.memory_space<vmem>>, vector<1x128xf32>
    %4 = vector.broadcast %3 : vector<1x128xf32> to vector<8x128xf32>
    %5 = arith.addf %2, %4 : vector<8x128xf32>
    %cst_5 = arith.constant 0.000000e+00 : f32
    %6 = vector.broadcast %cst_5 : f32 to vector<8x128xf32>
    %7 = arith.maximumf %5, %6 : vector<8x128xf32>
    %8 = arith.truncf %7 : vector<8x128xf32> to vector<8x128xbf16>
    %c0_6 = arith.constant 0 : index
    %c0_7 = arith.constant 0 : index
    %c0_8 = arith.constant 0 : index
    %9 = vector.load %arg4[%c0_6, %c0_7, %c0_8] : memref<2x128x128xbf16, #tpu.memory_space<vmem>>, vector<1x128x128xbf16>
    %10 = vector.shape_cast %9 : vector<1x128x128xbf16> to vector<128x128xbf16>
    %cst_9 = arith.constant dense<0.000000e+00> : vector<8x128xf32>
    %11 = tpu.matmul %8, %10, %cst_9 {dimension_numbers = #tpu.dot_dimension_numbers<[1], [0], [0], [1], [0, 0, 1, 1], [], []>} : vector<8x128xbf16>, vector<128x128xbf16>, vector<8x128xf32> -> vector<8x128xf32>
    %c0_10 = arith.constant 0 : index
    %c0_11 = arith.constant 0 : index
    %c0_12 = arith.constant 0 : index
    %12 = vector.load %arg5[%c0_10, %c0_11, %c0_12] : memref<2x1x128xf32, #tpu.memory_space<vmem>>, vector<1x1x128xf32>
    %13 = vector.shape_cast %12 : vector<1x1x128xf32> to vector<1x128xf32>
    %14 = vector.broadcast %13 : vector<1x128xf32> to vector<8x128xf32>
    %15 = arith.addf %11, %14 : vector<8x128xf32>
    %cst_13 = arith.constant 0.000000e+00 : f32
    %16 = vector.broadcast %cst_13 : f32 to vector<8x128xf32>
    %17 = arith.maximumf %15, %16 : vector<8x128xf32>
    %18 = arith.truncf %17 : vector<8x128xf32> to vector<8x128xbf16>
    %c1 = arith.constant 1 : index
    %c0_14 = arith.constant 0 : index
    %c0_15 = arith.constant 0 : index
    %19 = vector.load %arg4[%c1, %c0_14, %c0_15] : memref<2x128x128xbf16, #tpu.memory_space<vmem>>, vector<1x128x128xbf16>
    %20 = vector.shape_cast %19 : vector<1x128x128xbf16> to vector<128x128xbf16>
    %cst_16 = arith.constant dense<0.000000e+00> : vector<8x128xf32>
    %21 = tpu.matmul %18, %20, %cst_16 {dimension_numbers = #tpu.dot_dimension_numbers<[1], [0], [0], [1], [0, 0, 1, 1], [], []>} : vector<8x128xbf16>, vector<128x128xbf16>, vector<8x128xf32> -> vector<8x128xf32>
    %c1_17 = arith.constant 1 : index
    %c0_18 = arith.constant 0 : index
    %c0_19 = arith.constant 0 : index
    %22 = vector.load %arg5[%c1_17, %c0_18, %c0_19] : memref<2x1x128xf32, #tpu.memory_space<vmem>>, vector<1x1x128xf32>
    %23 = vector.shape_cast %22 : vector<1x1x128xf32> to vector<1x128xf32>
    %24 = vector.broadcast %23 : vector<1x128xf32> to vector<8x128xf32>
    %25 = arith.addf %21, %24 : vector<8x128xf32>
    %cst_20 = arith.constant 0.000000e+00 : f32
    %26 = vector.broadcast %cst_20 : f32 to vector<8x128xf32>
    %27 = arith.maximumf %25, %26 : vector<8x128xf32>
    %28 = arith.truncf %27 : vector<8x128xf32> to vector<8x128xbf16>
    %c0_21 = arith.constant 0 : index
    %c0_22 = arith.constant 0 : index
    %29 = vector.load %arg6[%c0_21, %c0_22] : memref<128x128xbf16, #tpu.memory_space<vmem>>, vector<128x128xbf16>
    %cst_23 = arith.constant dense<0.000000e+00> : vector<8x128xf32>
    %30 = tpu.matmul %28, %29, %cst_23 {dimension_numbers = #tpu.dot_dimension_numbers<[1], [0], [0], [1], [0, 0, 1, 1], [], []>} : vector<8x128xbf16>, vector<128x128xbf16>, vector<8x128xf32> -> vector<8x128xf32>
    %c0_24 = arith.constant 0 : index
    %c0_25 = arith.constant 0 : index
    %31 = vector.load %arg7[%c0_24, %c0_25] : memref<1x128xf32, #tpu.memory_space<vmem>>, vector<1x128xf32>
    %32 = vector.broadcast %31 : vector<1x128xf32> to vector<8x128xf32>
    %33 = arith.addf %30, %32 : vector<8x128xf32>
    %c0_26 = arith.constant 0 : index
    %c0_27 = arith.constant 0 : index
    %34 = vector.load %arg8[%c0_26, %c0_27] : memref<8x128xf32, #tpu.memory_space<vmem>>, vector<8x128xf32>
    tpu.vector_store %arg8[%c0_26, %c0_27], %33 {strides = array<i32>} : memref<8x128xf32, #tpu.memory_space<vmem>>, vector<8x128xf32>,
    return
  }
  func.func @transform_0(%arg0: i32) -> (i32, i32) {
    %c0_i32 = arith.constant 0 : i32
    %c0_i32_0 = arith.constant 0 : i32
    return %arg0, %c0_i32 : i32, i32
  }
  func.func @transform_1(%arg0: i32) -> (i32, i32) {
    %c0_i32 = arith.constant 0 : i32
    %c0_i32_0 = arith.constant 0 : i32
    %c0_i32_1 = arith.constant 0 : i32
    return %c0_i32, %c0_i32_0 : i32, i32
  }
  func.func @transform_2(%arg0: i32) -> (i32, i32) {
    %c0_i32 = arith.constant 0 : i32
    %c0_i32_0 = arith.constant 0 : i32
    %c0_i32_1 = arith.constant 0 : i32
    return %c0_i32, %c0_i32_0 : i32, i32
  }
  func.func @transform_3(%arg0: i32) -> (i32, i32, i32) {
    %c0_i32 = arith.constant 0 : i32
    %c0_i32_0 = arith.constant 0 : i32
    %c0_i32_1 = arith.constant 0 : i32
    %c0_i32_2 = arith.constant 0 : i32
    return %c0_i32, %c0_i32_0, %c0_i32_1 : i32, i32, i32
  }
  func.func @transform_4(%arg0: i32) -> (i32, i32, i32) {
    %c0_i32 = arith.constant 0 : i32
    %c0_i32_0 = arith.constant 0 : i32
    %c0_i32_1 = arith.constant 0 : i32
    %c0_i32_2 = arith.constant 0 : i32
    return %c0_i32, %c0_i32_0, %c0_i32_1 : i32, i32, i32
  }
  func.func @transform_5(%arg0: i32) -> (i32, i32) {
    %c0_i32 = arith.constant 0 : i32
    %c0_i32_0 = arith.constant 0 : i32
    %c0_i32_1 = arith.constant 0 : i32
    return %c0_i32, %c0_i32_0 : i32, i32
  }
  func.func @transform_6(%arg0: i32) -> (i32, i32) {
    %c0_i32 = arith.constant 0 : i32
    %c0_i32_0 = arith.constant 0 : i32
    %c0_i32_1 = arith.constant 0 : i32
    return %c0_i32, %c0_i32_0 : i32, i32
  }
  func.func @transform_7(%arg0: i32) -> (i32, i32) {
    %c0_i32 = arith.constant 0 : i32
    %c0_i32_0 = arith.constant 0 : i32
    return %arg0, %c0_i32 : i32, i32
  }
}

</mosaic_0001>

<bundles_post_ra>
// kernel: dense_forward.1
= control target key start
LH: loop header
LB: loop body
LE: loop exit
PB: predicated region body
PF: predicated region fallthrough
CT: control target
= control target key end

     0   :  { %12 = vsyncpa [#allocation3], 0  ;;  %s1514_s24 = smov [#allocation2]   ;;  %s1691_s0 = inlined_call_operand.vmem [shape: bf16[8,1024], index: 0, kind: input, shape index: {}]   ;;  %s1692_s1 = inlined_call_operand.hbm [shape: bf16[1024,128], index: 1, kind: input, shape index: {}]   ;;  %s1693_s2 = inlined_call_operand.vmem [shape: f32[1,128], index: 2, kind: input, shape index: {}]   ;;  %s1694_s3 = inlined_call_operand.vmem [shape: bf16[2,128,128], index: 3, kind: input, shape index: {}]   ;;  %s1695_s4 = inlined_call_operand.vmem [shape: f32[2,1,128], index: 4, kind: input, shape index: {}]   ;;  %s1696_s5 = inlined_call_operand.vmem [shape: bf16[128,128], index: 5, kind: input, shape index: {}]   ;;  %s1697_s6 = inlined_call_operand.vmem [shape: f32[1,128], index: 6, kind: input, shape index: {}]   ;;  %s1698_s7 = inlined_call_operand.vmem [shape: f32[8,128], index: 7, kind: output, shape index: {}]  }
   0x1   :  { %s20_s25 = sshll.u32 %s1514_s24, 4  ;;  %s21_s25 = int_to_ptr.vmem [resolvable:$true] %s20_s25 }
   0x2   :  { %s1500_s26 = scalar_lea.vmem %s21_s25, 8192  ;;  %p1505_p1 = scmp.lt.s32.totalorder %s21_s25, %s21_s25 }
   0x3   :  { %p1501_p0 = scmp.ne.s32.totalorder %s21_s25, %s1500_s26  ;;  %p1506_p2 = scmp.lt.s32.totalorder %s1500_s26, %s1500_s26 }
   0x5   :  { %p1507_p3 = por %p1506_p2, %p1505_p1 }
   0x7   :  { %p1508_p4 = pnand %p1507_p3, %p1501_p0 }
   0x9   :  { %1511 = shalt.err (!%p1508_p4)
}
   0xa   :  { %s1515_s27 = smov 64   ;;  %s1516_s28 = smov 4  }
   0xb   :  { %26 = dma.hbm_to_vmem [thread:$0]  %s1692_s1, 8192, %s21_s25, [#allocation3], %s1515_s27, %s1515_s27, %s1516_s28  }
   0xc   :  { %1512 = dma.done.wait [#allocation3], 8192  }
   0xd   :  { %1513 = vsyncadd [#allocation3], 4294959104  ;;  %v1396_v0 = vld [vmem:[#allocation2 + $0x78] sm:$0xff]   ;;  %v1400_v4 = vld [vmem:[#allocation2 + $0x70] sm:$0xff]   ;;  %vm1518_vm0 = vmmov 0  }
   0xe   :  { %v1397_v1 = vld [vmem:[#allocation2 + $0xf8] sm:$0xff]   ;;  %1216 = vmatprep.subr.bf16.mxu0 %v1396_v0  ;;  %v1401_v5 = vld [vmem:[#allocation2 + $0xf0] sm:$0xff]   ;;  %v1404_v8 = vld [vmem:[#allocation2 + $0x68] sm:$0xff]  }
   0xf   :  { %v1398_v2 = vld [vmem:[#allocation2 + $0x38] sm:$0xff]   ;;  %1238 = vmatprep.subr.bf16.mxu1 %v1397_v1  ;;  %v1402_v6 = vld [vmem:[#allocation2 + $0x30] sm:$0xff]   ;;  %v1405_v9 = vld [vmem:[#allocation2 + $0xe8] sm:$0xff]  }
  0x10   :  { %v1399_v3 = vld [vmem:[#allocation2 + $0xb8] sm:$0xff]   ;;  %1217 = vmatpush3.bf16.msra.mxu0 %v1398_v2  ;;  %v1403_v7 = vld [vmem:[#allocation2 + $0xb0] sm:$0xff]   ;;  %v1406_v10 = vld [vmem:[#allocation2 + $0x28] sm:$0xff]  }
  0x11   :  { %1239 = vmatpush3.bf16.msra.mxu1 %v1399_v3  ;;  %1218 = vmatprep.subr.bf16.mxu0 %v1400_v4  ;;  %v1407_v11 = vld [vmem:[#allocation2 + $0xa8] sm:$0xff]   ;;  %v1408_v12 = vld [vmem:[#allocation2 + $0x60] sm:$0xff]   ;;  %v1412_v16 = vld [vmem:[#allocation2 + $0x58] sm:$0xff]  }
  0x12   :  { %1240 = vmatprep.subr.bf16.mxu1 %v1401_v5  ;;  %v1409_v13 = vld [vmem:[#allocation2 + $0xe0] sm:$0xff]   ;;  %v1413_v17 = vld [vmem:[#allocation2 + $0xd8] sm:$0xff]   ;;  %v1416_v20 = vld [vmem:[#allocation2 + $0x50] sm:$0xff]  }
  0x13   :  { %v1410_v14 = vld [vmem:[#allocation2 + $0x20] sm:$0xff]   ;;  %v1414_v18 = vld [vmem:[#allocation2 + $0x18] sm:$0xff]   ;;  %v1417_v21 = vld [vmem:[#allocation2 + $0xd0] sm:$0xff]  }
  0x14   :  { %1219 = vmatpush3.bf16.msra.mxu0 %v1402_v6  ;;  %v1411_v15 = vld [vmem:[#allocation2 + $0xa0] sm:$0xff]   ;;  %v1415_v19 = vld [vmem:[#allocation2 + $0x98] sm:$0xff]   ;;  %v1418_v22 = vld [vmem:[#allocation2 + $0x10] sm:$0xff]  }
  0x15   :  { %1241 = vmatpush3.bf16.msra.mxu1 %v1403_v7  ;;  %1220 = vmatprep.subr.bf16.mxu0 %v1404_v8  ;;  %v1419_v23 = vld [vmem:[#allocation2 + $0x90] sm:$0xff]   ;;  %v1420_v24 = vld [vmem:[#allocation2 + $0x48] sm:$0xff]   ;;  %v1424_v28 = vld [vmem:[#allocation2 + $0x40] sm:$0xff]  }
  0x16   :  { %1242 = vmatprep.subr.bf16.mxu1 %v1405_v9  ;;  %v1421_v25 = vld [vmem:[#allocation2 + $0xc8] sm:$0xff]   ;;  %v1425_v29 = vld [vmem:[#allocation2 + $0xc0] sm:$0xff]   ;;  %v1432_v38 = vld [vmem:[#allocation2 + $0x178] sm:$0xff]  }
  0x17   :  { %v1422_v26 = vld [vmem:[#allocation2 + $0x8] sm:$0xff]   ;;  %v1426_v30 = vld [vmem:[#allocation2] sm:$0xff]   ;;  %v1433_v39 = vld [vmem:[#allocation2 + $0x1f8] sm:$0xff]  }
  0x18   :  { %1221 = vmatpush3.bf16.msra.mxu0 %v1406_v10  ;;  %v1423_v27 = vld [vmem:[#allocation2 + $0x88] sm:$0xff]   ;;  %v1427_v31 = vld [vmem:[#allocation2 + $0x80] sm:$0xff]   ;;  %v1434_v40 = vld [vmem:[#allocation2 + $0x138] sm:$0xff]  }
  0x19   :  { %1243 = vmatpush3.bf16.msra.mxu1 %v1407_v11  ;;  %1222 = vmatprep.subr.bf16.mxu0 %v1408_v12  ;;  %v41_v32 = vld [vmem:[%s1691_s0] sm:$0xff]  ;;  %v42_v33 = vld [vmem:[%s1691_s0 + $0x8] sm:$0xff]  ;;  %v1435_v41 = vld [vmem:[#allocation2 + $0x1b8] sm:$0xff]  }
  0x1a   :  { %1244 = vmatprep.subr.bf16.mxu1 %v1409_v13  ;;  %v1100_v34 = vcombine.low %v41_v32, %v41_v32  ;;  %v1101_v35 = vcombine.high %v41_v32, %v41_v32  ;;  %v1102_v36 = vcombine.low %v42_v33, %v42_v33  ;;  %v1103_v37 = vcombine.high %v42_v33, %v42_v33  ;;  %v1436_v42 = vld [vmem:[#allocation2 + $0x170] sm:$0xff]   ;;  %v1440_v46 = vld [vmem:[#allocation2 + $0x168] sm:$0xff]   ;;  %v1444_v50 = vld [vmem:[#allocation2 + $0x160] sm:$0xff]  }
  0x1b   :  { %v1437_v43 = vld [vmem:[#allocation2 + $0x1f0] sm:$0xff]   ;;  %v1441_v47 = vld [vmem:[#allocation2 + $0x1e8] sm:$0xff]   ;;  %v1445_v51 = vld [vmem:[#allocation2 + $0x1e0] sm:$0xff]   ;;  %v1517_v13 = vmov 0.0  }
  0x1c   :  { %1223 = vmatpush3.bf16.msra.mxu0 %v1410_v14  ;;  %624 = vmatprep.mubr.bf16.mxu0 %v1101_v35  ;;  %v1438_v44 = vld [vmem:[#allocation2 + $0x130] sm:$0xff]   ;;  %v1442_v48 = vld [vmem:[#allocation2 + $0x128] sm:$0xff]   ;;  %v1446_v52 = vld [vmem:[#allocation2 + $0x120] sm:$0xff]  }
  0x1d   :  { %1245 = vmatpush3.bf16.msra.mxu1 %v1411_v15  ;;  %1224 = vmatprep.subr.bf16.mxu0 %v1412_v16  ;;  %v1439_v45 = vld [vmem:[#allocation2 + $0x1b0] sm:$0xff]   ;;  %v1443_v49 = vld [vmem:[#allocation2 + $0x1a8] sm:$0xff]   ;;  %v1447_v53 = vld [vmem:[#allocation2 + $0x1a0] sm:$0xff]  }
  0x1e   :  { %1246 = vmatprep.subr.bf16.mxu1 %v1413_v17  ;;  %664 = vmatprep.mubr.bf16.mxu1 %v1103_v37  ;;  %v1448_v54 = vld [vmem:[#allocation2 + $0x158] sm:$0xff]   ;;  %v1452_v58 = vld [vmem:[#allocation2 + $0x150] sm:$0xff]   ;;  %v1456_v62 = vld [vmem:[#allocation2 + $0x148] sm:$0xff]  }
  0x1f   :  { %v1449_v55 = vld [vmem:[#allocation2 + $0x1d8] sm:$0xff]   ;;  %v1453_v59 = vld [vmem:[#allocation2 + $0x1d0] sm:$0xff]   ;;  %v1457_v63 = vld [vmem:[#allocation2 + $0x1c8] sm:$0xff]  }
  0x20   :  { %1225 = vmatpush3.bf16.msra.mxu0 %v1414_v18  ;;  %v1450_v56 = vld [vmem:[#allocation2 + $0x118] sm:$0xff]   ;;  %v1454_v60 = vld [vmem:[#allocation2 + $0x110] sm:$0xff]   ;;  %v1458_v0 = vld [vmem:[#allocation2 + $0x108] sm:$0xff]  }
  0x21   :  { %1247 = vmatpush3.bf16.msra.mxu1 %v1415_v19  ;;  %1226 = vmatprep.subr.bf16.mxu0 %v1416_v20  ;;  %v1451_v57 = vld [vmem:[#allocation2 + $0x198] sm:$0xff]   ;;  %v1455_v61 = vld [vmem:[#allocation2 + $0x190] sm:$0xff]   ;;  %v1459_v1 = vld [vmem:[#allocation2 + $0x188] sm:$0xff]  }
  0x22   :  { %1248 = vmatprep.subr.bf16.mxu1 %v1417_v21  ;;  %v1460_v2 = vld [vmem:[#allocation2 + $0x140] sm:$0xff]   ;;  %v43_v6 = vld [vmem:[%s1691_s0 + $0x10] sm:$0xff]  ;;  %v44_v9 = vld [vmem:[%s1691_s0 + $0x18] sm:$0xff] }
  0x23   :  { %v1461_v3 = vld [vmem:[#allocation2 + $0x1c0] sm:$0xff]   ;;  %v1104_v7 = vcombine.low %v43_v6, %v43_v6  ;;  %v1105_v8 = vcombine.high %v43_v6, %v43_v6  ;;  %v1106_v10 = vcombine.low %v44_v9, %v44_v9  ;;  %v1107_v11 = vcombine.high %v44_v9, %v44_v9  ;;  %v1468_v12 = vld [vmem:[%s1694_s3 + $0x38] sm:$0xff]   ;;  %v1469_v14 = vld [vmem:[%s1694_s3 + $0x30] sm:$0xff]  }
  0x24   :  { %1227 = vmatpush3.bf16.msra.mxu0 %v1418_v22  ;;  %v1462_v4 = vld [vmem:[#allocation2 + $0x100] sm:$0xff]   ;;  %v1470_v15 = vld [vmem:[%s1694_s3 + $0x28] sm:$0xff]   ;;  %v1472_v17 = vld [vmem:[%s1694_s3 + $0x18] sm:$0xff]  }
  0x25   :  { %1249 = vmatpush3.bf16.msra.mxu1 %v1419_v23  ;;  %1228 = vmatprep.subr.bf16.mxu0 %v1420_v24  ;;  %v1463_v5 = vld [vmem:[#allocation2 + $0x180] sm:$0xff]   ;;  %v1473_v18 = vld [vmem:[%s1694_s3 + $0x10] sm:$0xff]   ;;  %v1474_v19 = vld [vmem:[%s1694_s3 + $0x8] sm:$0xff]  }
  0x26   :  { %1250 = vmatprep.subr.bf16.mxu1 %v1421_v25  ;;  %v1471_v16 = vld [vmem:[%s1694_s3 + $0x20] sm:$0xff]   ;;  %v1476_v21 = vld [vmem:[%s1694_s3 + $0x78] sm:$0xff]   ;;  %v1477_v22 = vld [vmem:[%s1694_s3 + $0x70] sm:$0xff]  }
  0x27   :  { %v1475_v20 = vld [vmem:[%s1694_s3] sm:$0xff]   ;;  %v1478_v23 = vld [vmem:[%s1694_s3 + $0x68] sm:$0xff]   ;;  %v1480_v25 = vld [vmem:[%s1694_s3 + $0x58] sm:$0xff]  }
  0x28   :  { %1229 = vmatpush3.bf16.msra.mxu0 %v1422_v26  ;;  %v1479_v24 = vld [vmem:[%s1694_s3 + $0x60] sm:$0xff]   ;;  %v1481_v26 = vld [vmem:[%s1694_s3 + $0x50] sm:$0xff]   ;;  %v1490_v6 = vld [vmem:[%s1696_s5 + $0x8] sm:$0xff]  }
  0x29   :  { %1251 = vmatpush3.bf16.msra.mxu1 %v1423_v27  ;;  %1230 = vmatprep.subr.bf16.mxu0 %v1424_v28 }
  0x2a   :  { %1252 = vmatprep.subr.bf16.mxu1 %v1425_v29 }
  0x2c   :  { %1231 = vmatpush3.bf16.msra.mxu0 %v1426_v30 }
  0x2d   :  { %1253 = vmatpush3.bf16.msra.mxu1 %v1427_v31  ;;  %1260 = vmatprep.subr.bf16.mxu0 %v1432_v38 }
  0x2e   :  { %1282 = vmatprep.subr.bf16.mxu1 %v1433_v39 }
  0x2f   :  { %625 = vmatmul.mubr.bf16.vlgmr.msra.gmra.mxu0 %v1100_v34 }
  0x30   :  { %665 = vmatmul.mubr.bf16.vlgmr.msra.gmra.mxu1 %v1102_v36  ;;  %1261 = vmatpush3.bf16.msra.mxu0 %v1434_v40  ;;  %v1099_v36 = vld [vmem:[%s1693_s2] ss:$0 sm:$0xff] }
  0x31   :  { %1283 = vmatpush3.bf16.msra.mxu1 %v1435_v41  ;;  %1262 = vmatprep.subr.bf16.mxu0 %v1436_v42 }
  0x32   :  { %1284 = vmatprep.subr.bf16.mxu1 %v1437_v43  ;;  %704 = vmatprep.mubr.bf16.mxu0 %v1105_v8  ;;  %v1198_v8 = vld [vmem:[%s1695_s4 + $0x1] ss:$0 sm:$0xff] }
  0x33   :  { %744 = vmatprep.mubr.bf16.mxu1 %v1107_v11 }
  0x34   :  { %1263 = vmatpush3.bf16.msra.mxu0 %v1438_v44 }
  0x35   :  { %1285 = vmatpush3.bf16.msra.mxu1 %v1439_v45  ;;  %1264 = vmatprep.subr.bf16.mxu0 %v1440_v46 }
  0x36   :  { %1286 = vmatprep.subr.bf16.mxu1 %v1441_v47 }
  0x38   :  { %1265 = vmatpush3.bf16.msra.mxu0 %v1442_v48 }
  0x39   :  { %1287 = vmatpush3.bf16.msra.mxu1 %v1443_v49  ;;  %1266 = vmatprep.subr.bf16.mxu0 %v1444_v50 }
  0x3a   :  { %1288 = vmatprep.subr.bf16.mxu1 %v1445_v51 }
  0x3c   :  { %1267 = vmatpush3.bf16.msra.mxu0 %v1446_v52 }
  0x3d   :  { %1289 = vmatpush3.bf16.msra.mxu1 %v1447_v53  ;;  %1268 = vmatprep.subr.bf16.mxu0 %v1448_v54  ;;  %v1482_v54 = vld [vmem:[%s1694_s3 + $0x48] sm:$0xff]  }
  0x3e   :  { %1290 = vmatprep.subr.bf16.mxu1 %v1449_v55  ;;  %v1483_v55 = vld [vmem:[%s1694_s3 + $0x40] sm:$0xff]  }
  0x40   :  { %1269 = vmatpush3.bf16.msra.mxu0 %v1450_v56  ;;  %v1484_v56 = vld [vmem:[%s1696_s5 + $0x38] sm:$0xff]  }
  0x41   :  { %1291 = vmatpush3.bf16.msra.mxu1 %v1451_v57  ;;  %1270 = vmatprep.subr.bf16.mxu0 %v1452_v58  ;;  %v1485_v57 = vld [vmem:[%s1696_s5 + $0x30] sm:$0xff]   ;;  %v1486_v58 = vld [vmem:[%s1696_s5 + $0x28] sm:$0xff]  }
  0x42   :  { %1292 = vmatprep.subr.bf16.mxu1 %v1453_v59  ;;  %v1487_v59 = vld [vmem:[%s1696_s5 + $0x20] sm:$0xff]  }
  0x44   :  { %1271 = vmatpush3.bf16.msra.mxu0 %v1454_v60  ;;  %v1488_v60 = vld [vmem:[%s1696_s5 + $0x18] sm:$0xff]  }
  0x45   :  { %1293 = vmatpush3.bf16.msra.mxu1 %v1455_v61  ;;  %1272 = vmatprep.subr.bf16.mxu0 %v1456_v62  ;;  %v1489_v61 = vld [vmem:[%s1696_s5 + $0x10] sm:$0xff]   ;;  %v1172_v62 = vld [vmem:[%s1695_s4] ss:$0 sm:$0xff] }
  0x46   :  { %1294 = vmatprep.subr.bf16.mxu1 %v1457_v63 }
  0x48   :  { %1273 = vmatpush3.bf16.msra.mxu0 %v1458_v0 }
  0x49   :  { %1295 = vmatpush3.bf16.msra.mxu1 %v1459_v1  ;;  %1274 = vmatprep.subr.bf16.mxu0 %v1460_v2 }
  0x4a   :  { %1296 = vmatprep.subr.bf16.mxu1 %v1461_v3 }
  0x4c   :  { %1275 = vmatpush3.bf16.msra.mxu0 %v1462_v4 }
  0x4d   :  { %1297 = vmatpush3.bf16.msra.mxu1 %v1463_v5  ;;  %1331 = vmatprep.subr.bf16.mxu0 %v1517_v13 }
  0x4e   :  { %1351 = vmatprep.subr.bf16.mxu1 %v1517_v13 }
  0x4f   :  { %705 = vmatmul.mubr.bf16.vlgmr.msra.gmra.mxu0 %v1104_v7  ;;  %v1491_v7 = vld [vmem:[%s1696_s5] sm:$0xff]  }
  0x50   :  { %745 = vmatmul.mubr.bf16.vlgmr.msra.gmra.mxu1 %v1106_v10  ;;  %1332 = vmatpush3.bf16.msra.mxu0 %v1468_v12 }
  0x51   :  { %1333 = vmatprep.subr.bf16.mxu0 %v1517_v13  ;;  %1347 = vmatprep.mubr.msk.bf16.mxu0 %vm1518_vm0, %v1517_v13 }
  0x52   :  { %1367 = vmatprep.mubr.msk.bf16.mxu1 %vm1518_vm0, %v1517_v13  ;;  %1352 = vmatpush3.bf16.msra.mxu1 %v1476_v21 }
  0x53   :  { %1353 = vmatprep.subr.bf16.mxu1 %v1517_v13 }
  0x54   :  { %1334 = vmatpush3.bf16.msra.mxu0 %v1469_v14 }
  0x55   :  { %1335 = vmatprep.subr.bf16.mxu0 %v1517_v13 }
  0x56   :  { %1354 = vmatpush3.bf16.msra.mxu1 %v1477_v22 }
  0x57   :  { %1355 = vmatprep.subr.bf16.mxu1 %v1517_v13 }
  0x58   :  { %1336 = vmatpush3.bf16.msra.mxu0 %v1470_v15 }
  0x59   :  { %1337 = vmatprep.subr.bf16.mxu0 %v1517_v13 }
  0x5a   :  { %1356 = vmatpush3.bf16.msra.mxu1 %v1478_v23 }
  0x5b   :  { %1357 = vmatprep.subr.bf16.mxu1 %v1517_v13 }
  0x5c   :  { %1338 = vmatpush3.bf16.msra.mxu0 %v1471_v16 }
  0x5d   :  { %1339 = vmatprep.subr.bf16.mxu0 %v1517_v13 }
  0x5e   :  { %1358 = vmatpush3.bf16.msra.mxu1 %v1479_v24 }
  0x5f   :  { %1359 = vmatprep.subr.bf16.mxu1 %v1517_v13 }
  0x60   :  { %1340 = vmatpush3.bf16.msra.mxu0 %v1472_v17 }
  0x61   :  { %1341 = vmatprep.subr.bf16.mxu0 %v1517_v13 }
  0x62   :  { %1360 = vmatpush3.bf16.msra.mxu1 %v1480_v25 }
  0x63   :  { %1361 = vmatprep.subr.bf16.mxu1 %v1517_v13 }
  0x64   :  { %1342 = vmatpush3.bf16.msra.mxu0 %v1473_v18 }
  0x65   :  { %1343 = vmatprep.subr.bf16.mxu0 %v1517_v13 }
  0x66   :  { %1362 = vmatpush3.bf16.msra.mxu1 %v1481_v26 }
  0x67   :  { %1363 = vmatprep.subr.bf16.mxu1 %v1517_v13 }
  0x68   :  { %1344 = vmatpush3.bf16.msra.mxu0 %v1474_v19 }
  0x69   :  { %1345 = vmatprep.subr.bf16.mxu0 %v1517_v13 }
  0x6a   :  { %1364 = vmatpush3.bf16.msra.mxu1 %v1482_v54 }
  0x6b   :  { %1365 = vmatprep.subr.bf16.mxu1 %v1517_v13 }
  0x6c   :  { %1346 = vmatpush3.bf16.msra.mxu0 %v1475_v20 }
  0x6d   :  { %1371 = vmatprep.subr.bf16.mxu0 %v1517_v13 }
  0x6e   :  { %1366 = vmatpush3.bf16.msra.mxu1 %v1483_v55 }
  0xef   :  { %v1232_v27 = vpop.f32.mrf.mxu0 }
  0xf0   :  { %v1254_v28 = vpop.f32.mrf.mxu1 }
  0xf1   :  { %v1233_v29 = vpop.f32.mrf.mxu0 }
  0xf2   :  { %v1255_v30 = vpop.f32.mrf.mxu1  ;;  %v1234_v35 = vadd.f32 %v1233_v29, %v1232_v27 }
  0xf3   :  { %v1235_v31 = vpop.f32.mrf.mxu0  ;;  %v1256_v38 = vadd.f32 %v1255_v30, %v1254_v28 }
  0xf4   :  { %v1257_v32 = vpop.f32.mrf.mxu1  ;;  %v627_v37 = vadd.f32 %v1234_v35, %v1099_v36 }
  0xf5   :  { %v1236_v33 = vpop.f32.mrf.mxu0 }
  0xf6   :  { %v1258_v34 = vpop.f32.mrf.mxu1  ;;  %v667_v43 = vadd.f32 %v1256_v38, %v627_v37 }
 0x10f   :  { %v1276_v39 = vpop.f32.mrf.mxu0 }
 0x110   :  { %v1298_v40 = vpop.f32.mrf.mxu1 }
 0x111   :  { %v1277_v41 = vpop.f32.mrf.mxu0 }
 0x112   :  { %v1299_v42 = vpop.f32.mrf.mxu1  ;;  %v1278_v44 = vadd.f32 %v1277_v41, %v1276_v39 }
 0x113   :  { %v1279_v45 = vpop.f32.mrf.mxu0  ;;  %v1300_v48 = vadd.f32 %v1299_v42, %v1298_v40 }
 0x114   :  { %v1301_v46 = vpop.f32.mrf.mxu1  ;;  %v707_v47 = vadd.f32 %v1278_v44, %v667_v43 }
 0x115   :  { %v1280_v49 = vpop.f32.mrf.mxu0 }
 0x116   :  { %v1302_v50 = vpop.f32.mrf.mxu1  ;;  %v747_v51 = vadd.f32 %v1300_v48, %v707_v47 }
 0x118   :  { %v752_v52 = vmax.f32 %v747_v51, 0.0 }
 0x11a   :  { %v753_v53 = vpack.c.bf16 %v752_v52, %v752_v52 }
 0x11c   :  { %1348 = vmatmul.mubr.bf16.vlgmr.msra.gmra.mxu0 %v753_v53 }
 0x11d   :  { %1387 = vmatprep.mubr.msk.bf16.mxu0 %vm1518_vm0, %v1517_v13  ;;  %1372 = vmatpush3.bf16.msra.mxu0 %v1484_v56 }
 0x11e   :  { %1373 = vmatprep.subr.bf16.mxu0 %v1517_v13 }
 0x121   :  { %1374 = vmatpush3.bf16.msra.mxu0 %v1485_v57 }
 0x122   :  { %1375 = vmatprep.subr.bf16.mxu0 %v1517_v13 }
 0x125   :  { %1376 = vmatpush3.bf16.msra.mxu0 %v1486_v58 }
 0x126   :  { %1377 = vmatprep.subr.bf16.mxu0 %v1517_v13 }
 0x129   :  { %1378 = vmatpush3.bf16.msra.mxu0 %v1487_v59 }
 0x12a   :  { %1379 = vmatprep.subr.bf16.mxu0 %v1517_v13 }
 0x12d   :  { %1380 = vmatpush3.bf16.msra.mxu0 %v1488_v60 }
 0x12e   :  { %1381 = vmatprep.subr.bf16.mxu0 %v1517_v13 }
 0x131   :  { %1382 = vmatpush3.bf16.msra.mxu0 %v1489_v61 }
 0x132   :  { %1383 = vmatprep.subr.bf16.mxu0 %v1517_v13 }
 0x135   :  { %1384 = vmatpush3.bf16.msra.mxu0 %v1490_v6 }
 0x136   :  { %1385 = vmatprep.subr.bf16.mxu0 %v1517_v13  ;;  %v1207_v13 = vld [vmem:[%s1697_s6] ss:$0 sm:$0xff] }
 0x139   :  { %1386 = vmatpush3.bf16.msra.mxu0 %v1491_v7 }
 0x1dc   :  { %v859_v63 = vpop.f32.mrf.mxu0 }
 0x1dd   :  { %v860_v0 = vadd.f32 %v1172_v62, %v859_v63 }
 0x1de   :  { %v1349_v1 = vpop.f32.mrf.mxu0 }
 0x1df   :  { %v865_v2 = vmax.f32 %v860_v0, 0.0 }
 0x1e0   :  { %v862_v3 = vpop.f32.mrf.mxu0 }
 0x1e1   :  { %v866_v4 = vpack.c.bf16 %v865_v2, %v865_v2 }
 0x1e2   :  { %v1350_v5 = vpop.f32.mrf.mxu0 }
 0x1e3   :  { %1368 = vmatmul.mubr.bf16.vlgmr.msra.gmra.mxu1 %v866_v4 }
 0x2a3   :  { %v974_v9 = vpop.f32.mrf.mxu1 }
 0x2a4   :  { %v975_v10 = vadd.f32 %v1198_v8, %v974_v9 }
 0x2a5   :  { %v1369_v11 = vpop.f32.mrf.mxu1 }
 0x2a6   :  { %v980_v12 = vmax.f32 %v975_v10, 0.0 }
 0x2a7   :  { %v977_v14 = vpop.f32.mrf.mxu1 }
 0x2a8   :  { %v981_v15 = vpack.c.bf16 %v980_v12, %v980_v12 }
 0x2a9   :  { %v1370_v16 = vpop.f32.mrf.mxu1 }
 0x2aa   :  { %1388 = vmatmul.mubr.bf16.vlgmr.msra.gmra.mxu0 %v981_v15 }
 0x36a   :  { %v1087_v17 = vpop.f32.mrf.mxu0 }
 0x36b   :  { %v1088_v18 = vadd.f32 %v1207_v13, %v1087_v17 }
 0x36c   :  { %v1389_v19 = vpop.f32.mrf.mxu0 }
 0x36d   :  { %1093 = vst [vmem:[%s1698_s7] sm:$0xff] %v1088_v18 }
 0x36e   :  { %v1090_v20 = vpop.f32.mrf.mxu0 }
 0x370   :  { %v1390_v21 = vpop.f32.mrf.mxu0 }
 0x371   :  { %1098 = vsyncpa [#allocation3], 1 }

</bundles_post_ra>
